<compile_context>
chip_gen: v7x
topology: tpu7x:2x2x1
jax: 0.10.0
libtpu: 0.0.40
codegen_flags: <defaults>
</compile_context>

<pallas_src>
import functools

import jax
import jax.numpy as jnp
from jax.experimental import pallas as pl
from jax.experimental.pallas import tpu as pltpu

EPSILON = 1e-10


# ---------------------------------------------------------------------------
# VMEM budgeting (per TPU generation)
# ---------------------------------------------------------------------------

@functools.lru_cache(maxsize=1)
def _vmem_capacity_bytes():
    # NOTE: cached once per process; correct as long as the process targets a
    # single TPU generation (the normal case).
    try:
        return int(pltpu.get_tpu_info().vmem_capacity_bytes)
    except Exception:
        return 64 << 20  # conservative fallback (v7x per-core physical VMEM)


def _pipeline_budget_bytes():
    # 128 MiB-VMEM parts (v5e/v6e) -> 48 MiB pipeline budget; v7x (64 MiB) -> 32 MiB.
    return int(min(_vmem_capacity_bytes() // 2, 48 << 20))


def _compiler_params(dims):
    cap = _vmem_capacity_bytes()
    return pltpu.CompilerParams(
        dimension_semantics=dims,
        vmem_limit_bytes=int(min(cap * 3 // 4, 96 << 20)),
    )


def _sublane_multiple(itemsize):
    # Packed sublane count: f32 -> 8, bf16 -> 16, int8/fp8 -> 32.
    return max(8, 32 // max(int(itemsize), 1))


def _cap_lane_tile_for_cores(HW, hwt, n_outer, min_blocks=4, lane=128):
    """Cap the pixel tile so N * n_pixel_blocks >= min_blocks (keeps both v7x TCs busy)."""
    if HW < min_blocks * lane:
        return hwt
    if n_outer * pl.cdiv(HW, hwt) >= min_blocks:
        return hwt
    per_axis = pl.cdiv(min_blocks, max(n_outer, 1))
    cap = max(lane, (HW // per_axis) // lane * lane)
    return min(hwt, cap)


def _pick_hw_tile(C, HW, N, n_streams=3, extra_bytes=0, itemsize=4):
    """Pixel tile (lanes) for (1, C, hwt) blocks; physical (sublane-padded) accounting."""
    sm = _sublane_multiple(itemsize)
    c_pad_bytes = pl.cdiv(C, sm) * sm * itemsize      # physical bytes per pixel column
    per_block = max((_pipeline_budget_bytes() - 2 * extra_bytes) // (2 * n_streams),
                    64 * 1024)
    hwt = per_block // max(c_pad_bytes, 1)
    if hwt >= HW:
        hwt = HW
    else:
        hwt = max(128, (hwt // 128) * 128)
    return _cap_lane_tile_for_cores(HW, hwt, N)


def _pick_s_tile(C, S, N, n_streams=3, extra_bytes=0, itemsize=4):
    """Sublane-row tile for (1, C, St, 128) dense blocks."""
    sm = _sublane_multiple(itemsize)
    per_block = max((_pipeline_budget_bytes() - 2 * extra_bytes) // (2 * n_streams),
                    64 * 1024)
    st = per_block // max(C * 128 * itemsize, 1)
    st = max(sm, (st // sm) * sm)
    st = min(S, st)
    if S >= 4 * sm and N * pl.cdiv(S, st) < 4:
        cap = max(sm, (S // pl.cdiv(4, max(N, 1))) // sm * sm)
        st = min(st, cap)
    return st


# ---------------------------------------------------------------------------
# Kernels
# ---------------------------------------------------------------------------

def _add_kernel(t_ref, v_ref, o_ref):
    o_ref[...] = t_ref[...] + v_ref[...]


def _avg_kernel(t_ref, v_ref, o_ref):
    o_ref[...] = (t_ref[...] + v_ref[...]) * 0.5


def _spa_kernel3(t_ref, v_ref, o_ref):
    # Blocks (1, C, hwt): channel mean is a sublane reduce, lanes stay dense.
    t = t_ref[...].astype(jnp.float32)
    v = v_ref[...].astype(jnp.float32)
    st = jnp.mean(t, axis=1, keepdims=True)
    sv = jnp.mean(v, axis=1, keepdims=True)
    # Faithful to the PyTorch reference: no max-subtraction before exp.
    et = jnp.exp(st)
    ev = jnp.exp(sv)
    # Exact reciprocal kept so results match the reference to f32 precision
    # (approx=True would push it to the EUP; documented trade-off).
    inv = pl.reciprocal(et + ev + EPSILON)
    o_ref[...] = ((et * inv) * t + (ev * inv) * v).astype(o_ref.dtype)


def _spa_kernel4(t_ref, v_ref, o_ref):
    # Blocks (1, C, St, 128): channel mean = C-1 VPU adds on fully dense vregs.
    t = t_ref[...].astype(jnp.float32)
    v = v_ref[...].astype(jnp.float32)
    st = jnp.mean(t, axis=1, keepdims=True)
    sv = jnp.mean(v, axis=1, keepdims=True)
    et = jnp.exp(st)
    ev = jnp.exp(sv)
    inv = pl.reciprocal(et + ev + EPSILON)
    o_ref[...] = ((et * inv) * t + (ev * inv) * v).astype(o_ref.dtype)


def _cat_kernel_mxu(t_ref, v_ref, wt_ref, wv_ref, b_ref, o_ref):
    # 1x1 conv over concatenated channels as two K=C dots (no in-kernel concat,
    # activations stay in their native dtype; accumulate in f32 on the MXU).
    t = t_ref[0]                                   # (C, hwt)
    v = v_ref[0]
    acc = jnp.dot(wt_ref[...].astype(t.dtype), t, preferred_element_type=jnp.float32)
    acc = acc + jnp.dot(wv_ref[...].astype(v.dtype), v, preferred_element_type=jnp.float32)
    acc = acc + b_ref[...].astype(jnp.float32)     # (C, 1) broadcast over lanes
    o_ref[0] = acc.astype(o_ref.dtype)


def _cat_kernel_small(t_ref, v_ref, wt_ref, wv_ref, b_ref, o_ref):
    # Dense (St, 128) vregs per channel; weights/bias are SMEM scalars.
    C = t_ref.shape[1]
    t = t_ref[0].astype(jnp.float32)               # (C, St, 128)
    v = v_ref[0].astype(jnp.float32)
    outs = []
    for co in range(C):
        acc = jnp.zeros(t.shape[1:], jnp.float32) + b_ref[co]
        for ci in range(C):
            acc = acc + wt_ref[co, ci] * t[ci]
            acc = acc + wv_ref[co, ci] * v[ci]
        outs.append(acc)
    o_ref[0] = jnp.stack(outs, axis=0).astype(o_ref.dtype)


def _gated_kernel_mxu(t_ref, v_ref, wt_ref, bt_ref, wv_ref, bv_ref, o_ref):
    t = t_ref[0]                                   # (C, hwt)
    v = v_ref[0]
    zt = jnp.dot(wt_ref[...].astype(t.dtype), t, preferred_element_type=jnp.float32)
    zt = zt + bt_ref[...].astype(jnp.float32)
    zv = jnp.dot(wv_ref[...].astype(v.dtype), v, preferred_element_type=jnp.float32)
    zv = zv + bv_ref[...].astype(jnp.float32)
    out = jax.nn.sigmoid(zt) * t.astype(jnp.float32) + jax.nn.sigmoid(zv) * v.astype(jnp.float32)
    o_ref[0] = out.astype(o_ref.dtype)


def _gated_kernel_small(t_ref, v_ref, wt_ref, bt_ref, wv_ref, bv_ref, o_ref):
    C = t_ref.shape[1]
    t = t_ref[0].astype(jnp.float32)               # (C, St, 128)
    v = v_ref[0].astype(jnp.float32)
    outs = []
    for co in range(C):
        zt = jnp.zeros(t.shape[1:], jnp.float32) + bt_ref[co]
        zv = jnp.zeros(t.shape[1:], jnp.float32) + bv_ref[co]
        for ci in range(C):
            zt = zt + wt_ref[co, ci] * t[ci]
            zv = zv + wv_ref[co, ci] * v[ci]
        outs.append(jax.nn.sigmoid(zt) * t[co] + jax.nn.sigmoid(zv) * v[co])
    o_ref[0] = jnp.stack(outs, axis=0).astype(o_ref.dtype)


# ---------------------------------------------------------------------------
# pallas_call wrappers
# ---------------------------------------------------------------------------

def _elementwise_view(x):
    """Free (no-copy, no-pad) 2D lane-dense view of an arbitrary array."""
    total = int(x.size)
    for L in (4096, 2048, 1024, 512, 256, 128):
        if total % L == 0:
            return x.reshape(total // L, L)
    if x.ndim >= 2:
        lead = total // (x.shape[-2] * x.shape[-1])
        return x.reshape(lead, x.shape[-2] * x.shape[-1])
    return x.reshape(1, total)


def _elementwise_call(kernel, t2, v2):
    R, L = t2.shape
    itemsize = t2.dtype.itemsize
    sm = _sublane_multiple(itemsize)
    per_block = max(_pipeline_budget_bytes() // 6, 64 * 1024)   # 3 streams x 2 buffers
    tr = per_block // max(L * itemsize, 1)
    tr = max(sm, (tr // sm) * sm)
    tr = min(R, tr)
    if R >= 4 * sm and pl.cdiv(R, tr) < 4:                      # keep both v7x TCs busy
        tr = min(tr, max(sm, (R // 4) // sm * sm))
    grid = (pl.cdiv(R, tr),)
    spec = pl.BlockSpec((tr, L), lambda i: (i, 0))
    return pl.pallas_call(
        kernel,
        out_shape=jax.ShapeDtypeStruct((R, L), t2.dtype),
        grid_spec=pltpu.PrefetchScalarGridSpec(
            num_scalar_prefetch=0, grid=grid,
            in_specs=[spec, spec], out_specs=spec),
        compiler_params=_compiler_params(("parallel",)),
    )(t2, v2)


def _to_4d_dense(x3, HW):
    """(N, C, HW) -> (N, C, S, 128); pads the pixel axis once only if needed."""
    pad = (-HW) % 128
    if pad:
        x3 = jnp.pad(x3, ((0, 0), (0, 0), (0, pad)))
    S = (HW + pad) // 128
    return x3.reshape(x3.shape[0], x3.shape[1], S, 128), S, pad


def _from_4d_dense(out4, N, C, H, W, S, pad):
    out3 = out4.reshape(N, C, S * 128)
    if pad:
        out3 = out3[:, :, :H * W]
    return out3.reshape(N, C, H, W)


def _spa_call(t4, v4):
    N, C, H, W = t4.shape
    HW = H * W
    itemsize = t4.dtype.itemsize
    sm = _sublane_multiple(itemsize)
    t3 = t4.reshape(N, C, HW)
    v3 = v4.reshape(N, C, HW)
    if C % sm == 0:
        # Channel axis already fills the packed sublanes: keep (1, C, hwt) blocks.
        hwt = _pick_hw_tile(C, HW, N, n_streams=3, itemsize=itemsize)
        grid = (N, pl.cdiv(HW, hwt))
        spec = pl.BlockSpec((1, C, hwt), lambda n, p: (n, 0, p))
        out3 = pl.pallas_call(
            _spa_kernel3,
            out_shape=jax.ShapeDtypeStruct((N, C, HW), t4.dtype),
            grid_spec=pltpu.PrefetchScalarGridSpec(
                num_scalar_prefetch=0, grid=grid,
                in_specs=[spec, spec], out_specs=spec),
            compiler_params=_compiler_params(("parallel", "parallel")),
        )(t3, v3)
        return out3.reshape(N, C, H, W)
    # Small / non-aligned C: dense (St, 128) tiles, channel reduce on leading axis.
    t4d, S, pad = _to_4d_dense(t3, HW)
    v4d, _, _ = _to_4d_dense(v3, HW)
    st = _pick_s_tile(C, S, N, n_streams=3, itemsize=itemsize)
    grid = (N, pl.cdiv(S, st))
    spec = pl.BlockSpec((1, C, st, 128), lambda n, p: (n, 0, p, 0))
    out4 = pl.pallas_call(
        _spa_kernel4,
        out_shape=jax.ShapeDtypeStruct((N, C, S, 128), t4.dtype),
        grid_spec=pltpu.PrefetchScalarGridSpec(
            num_scalar_prefetch=0, grid=grid,
            in_specs=[spec, spec], out_specs=spec),
        compiler_params=_compiler_params(("parallel", "parallel")),
    )(t4d, v4d)
    return _from_4d_dense(out4, N, C, H, W, S, pad)


def _cat_call(t4, v4, wt, wv, b):
    N, C, H, W = t4.shape
    HW = H * W
    itemsize = t4.dtype.itemsize
    sm = _sublane_multiple(itemsize)
    t3 = t4.reshape(N, C, HW)
    v3 = v4.reshape(N, C, HW)
    if C >= sm:
        wbytes = 2 * (wt.size + wv.size + b.size) * 4
        hwt = _pick_hw_tile(C, HW, N, n_streams=3, extra_bytes=wbytes, itemsize=itemsize)
        grid = (N, pl.cdiv(HW, hwt))
        xspec = pl.BlockSpec((1, C, hwt), lambda n, p: (n, 0, p))
        wspec = pl.BlockSpec((C, C), lambda n, p: (0, 0))
        bspec = pl.BlockSpec((C, 1), lambda n, p: (0, 0))
        out3 = pl.pallas_call(
            _cat_kernel_mxu,
            out_shape=jax.ShapeDtypeStruct((N, C, HW), t4.dtype),
            grid_spec=pltpu.PrefetchScalarGridSpec(
                num_scalar_prefetch=0, grid=grid,
                in_specs=[xspec, xspec, wspec, wspec, bspec],
                out_specs=xspec),
            compiler_params=_compiler_params(("parallel", "parallel")),
        )(t3, v3, wt, wv, b.reshape(C, 1))
        return out3.reshape(N, C, H, W)
    # Small-C: dense pixel tiles + SMEM scalar weights (VPU broadcast MACs).
    t4d, S, pad = _to_4d_dense(t3, HW)
    v4d, _, _ = _to_4d_dense(v3, HW)
    st = _pick_s_tile(C, S, N, n_streams=3, itemsize=itemsize)
    grid = (N, pl.cdiv(S, st))
    xspec = pl.BlockSpec((1, C, st, 128), lambda n, p: (n, 0, p, 0))
    sspec = pl.BlockSpec(memory_space=pltpu.MemorySpace.SMEM)
    out4 = pl.pallas_call(
        _cat_kernel_small,
        out_shape=jax.ShapeDtypeStruct((N, C, S, 128), t4.dtype),
        grid_spec=pltpu.PrefetchScalarGridSpec(
            num_scalar_prefetch=0, grid=grid,
            in_specs=[xspec, xspec, sspec, sspec, sspec],
            out_specs=xspec),
        compiler_params=_compiler_params(("parallel", "parallel")),
    )(t4d, v4d, wt, wv, b)
    return _from_4d_dense(out4, N, C, H, W, S, pad)


def _gated_call(t4, v4, wt, bt, wv, bv):
    N, C, H, W = t4.shape
    HW = H * W
    itemsize = t4.dtype.itemsize
    sm = _sublane_multiple(itemsize)
    t3 = t4.reshape(N, C, HW)
    v3 = v4.reshape(N, C, HW)
    if C >= sm:
        wbytes = 2 * (wt.size + bt.size + wv.size + bv.size) * 4
        hwt = _pick_hw_tile(C, HW, N, n_streams=3, extra_bytes=wbytes, itemsize=itemsize)
        grid = (N, pl.cdiv(HW, hwt))
        xspec = pl.BlockSpec((1, C, hwt), lambda n, p: (n, 0, p))
        wspec = pl.BlockSpec((C, C), lambda n, p: (0, 0))
        bspec = pl.BlockSpec((C, 1), lambda n, p: (0, 0))
        out3 = pl.pallas_call(
            _gated_kernel_mxu,
            out_shape=jax.ShapeDtypeStruct((N, C, HW), t4.dtype),
            grid_spec=pltpu.PrefetchScalarGridSpec(
                num_scalar_prefetch=0, grid=grid,
                in_specs=[xspec, xspec, wspec, bspec, wspec, bspec],
                out_specs=xspec),
            compiler_params=_compiler_params(("parallel", "parallel")),
        )(t3, v3, wt, bt.reshape(C, 1), wv, bv.reshape(C, 1))
        return out3.reshape(N, C, H, W)
    t4d, S, pad = _to_4d_dense(t3, HW)
    v4d, _, _ = _to_4d_dense(v3, HW)
    st = _pick_s_tile(C, S, N, n_streams=3, itemsize=itemsize)
    grid = (N, pl.cdiv(S, st))
    xspec = pl.BlockSpec((1, C, st, 128), lambda n, p: (n, 0, p, 0))
    sspec = pl.BlockSpec(memory_space=pltpu.MemorySpace.SMEM)
    out4 = pl.pallas_call(
        _gated_kernel_small,
        out_shape=jax.ShapeDtypeStruct((N, C, S, 128), t4.dtype),
        grid_spec=pltpu.PrefetchScalarGridSpec(
            num_scalar_prefetch=0, grid=grid,
            in_specs=[xspec, xspec, sspec, sspec, sspec, sspec],
            out_specs=xspec),
        compiler_params=_compiler_params(("parallel", "parallel")),
    )(t4d, v4d, wt, bt, wv, bv)
    return _from_4d_dense(out4, N, C, H, W, S, pad)


# ---------------------------------------------------------------------------
# Fusion_strategy equivalent
# ---------------------------------------------------------------------------

class FusionStrategy:
    """JAX/Pallas port of Fusion_strategy (parameters init'd deterministically)."""

    def __init__(self, in_channels, key=None):
        C = in_channels
        if key is None:
            key = jax.random.PRNGKey(0)
        k1, k2, k3, k4, k5, k6 = jax.random.split(key, 6)
        # Fusion_CAT: Conv2d(2C -> C, k=1), weight stored pre-split into the
        # t-half and v-half (equivalent to W[:, :C] and W[:, C:]).
        self.cat_wt = jax.random.normal(k1, (C, C), jnp.float32) * 0.1
        self.cat_wv = jax.random.normal(k2, (C, C), jnp.float32) * 0.1
        self.cat_b = jax.random.normal(k2, (C,), jnp.float32) * 0.1
        # Fusion_GATED: two Conv2d(C -> C, k=1)
        self.gated_wt = jax.random.normal(k3, (C, C), jnp.float32) * 0.1
        self.gated_bt = jax.random.normal(k4, (C,), jnp.float32) * 0.1
        self.gated_wv = jax.random.normal(k5, (C, C), jnp.float32) * 0.1
        self.gated_bv = jax.random.normal(k6, (C,), jnp.float32) * 0.1

    def _fuse_one(self, feat_t, feat_v, fs_type):
        if fs_type == 'max':
            # Fusion_MAX.forward has no return statement in the reference
            # module -> result is None; skip launching any kernel (dead work).
            return None
        if fs_type in ('add', 'avg'):
            kernel = _add_kernel if fs_type == 'add' else _avg_kernel
            t2 = _elementwise_view(feat_t)
            v2 = _elementwise_view(feat_v)
            out2 = _elementwise_call(kernel, t2, v2)
            return out2.reshape(feat_t.shape)
        if fs_type == 'spa':
            return _spa_call(feat_t, feat_v)
        if fs_type == 'cat':
            return _cat_call(feat_t, feat_v, self.cat_wt, self.cat_wv, self.cat_b)
        if fs_type == 'gated':
            return _gated_call(feat_t, feat_v, self.gated_wt, self.gated_bt,
                               self.gated_wv, self.gated_bv)
        raise ValueError(f'There is no fusion_operation {fs_type}.')

    def __call__(self, feat_t, feat_v, fs_type):
        if isinstance(feat_t, (tuple, list)):
            return [self._fuse_one(t, v, fs_type) for t, v in zip(feat_t, feat_v)]
        return self._fuse_one(feat_t, feat_v, fs_type)


# ---------------------------------------------------------------------------
# Pure-JAX reference for verification
# ---------------------------------------------------------------------------

def _ref_fuse(model, feat_t, feat_v, fs_type):
    if fs_type == 'add':
        return feat_t + feat_v
    if fs_type == 'avg':
        return (feat_t + feat_v) / 2
    if fs_type == 'spa':
        st = jnp.mean(feat_t, axis=1, keepdims=True)
        sv = jnp.mean(feat_v, axis=1, keepdims=True)
        et, ev = jnp.exp(st), jnp.exp(sv)
        d = et + ev + EPSILON
        return (et / d) * feat_t + (ev / d) * feat_v
    if fs_type == 'cat':
        out = jnp.einsum('oc,nchw->nohw', model.cat_wt, feat_t)
        out = out + jnp.einsum('oc,nchw->nohw', model.cat_wv, feat_v)
        return out + model.cat_b.reshape(1, -1, 1, 1)
    if fs_type == 'gated':
        zt = jnp.einsum('oc,nchw->nohw', model.gated_wt, feat_t) \
            + model.gated_bt.reshape(1, -1, 1, 1)
        zv = jnp.einsum('oc,nchw->nohw', model.gated_wv, feat_v) \
            + model.gated_bv.reshape(1, -1, 1, 1)
        return jax.nn.sigmoid(zt) * feat_t + jax.nn.sigmoid(zv) * feat_v
    raise ValueError(fs_type)


if __name__ == "__main__":
    key = jax.random.PRNGKey(0)
    kt, kv, kp = jax.random.split(key, 3)
    N, C, H, W = 2, 4, 16, 16
    feat_t = jax.random.normal(kt, (N, C, H, W), jnp.float32)
    feat_v = jax.random.normal(kv, (N, C, H, W), jnp.float32)

    model = FusionStrategy(in_channels=C, key=kp)

    ok = True
    # Small-C (C=4) dense-layout paths
    for fs_type in ('add', 'avg', 'cat', 'spa', 'gated'):
        out = jax.block_until_ready(model(feat_t, feat_v, fs_type))
        ref = _ref_fuse(model, feat_t, feat_v, fs_type)
        if not jnp.allclose(out, ref, atol=1e-5, rtol=1e-5):
            ok = False
            err = float(jnp.max(jnp.abs(out - ref)))
            print(f"MISMATCH for {fs_type}: max abs err {err}")

    # 'max' path: PyTorch module returns None; no kernel is launched.
    assert model(feat_t, feat_v, 'max') is None

    # list-of-features path (the module supports tuples/lists of feature maps)
    outs = model([feat_t, feat_t], [feat_v, feat_v], 'add')
    jax.block_until_ready(outs)

    # odd spatial sizes exercise the ragged / padded-pixel small-C paths
    t_odd = jax.random.normal(kt, (1, 4, 7, 9), jnp.float32)
    v_odd = jax.random.normal(kv, (1, 4, 7, 9), jnp.float32)
    for fs_type in ('add', 'spa', 'cat', 'gated'):
        out = jax.block_until_ready(model(t_odd, v_odd, fs_type))
        ref = _ref_fuse(model, t_odd, v_odd, fs_type)
        if not jnp.allclose(out, ref, atol=1e-5, rtol=1e-5):
            ok = False
            print(f"MISMATCH (odd shape) for {fs_type}")

    # channel-on-sublane / MXU paths (C = sublane multiple for f32)
    C8 = 8
    model8 = FusionStrategy(in_channels=C8, key=kp)
    t8 = jax.random.normal(kt, (1, C8, 16, 16), jnp.float32)
    v8 = jax.random.normal(kv, (1, C8, 16, 16), jnp.float32)
    for fs_type in ('spa', 'cat', 'gated'):
        out = jax.block_until_ready(model8(t8, v8, fs_type))
        ref = _ref_fuse(model8, t8, v8, fs_type)
        if not jnp.allclose(out, ref, atol=1e-5, rtol=1e-5):
            ok = False
            print(f"MISMATCH (C=8 MXU path) for {fs_type}")

    if ok:
        print("KERNEL_OK")
</pallas_src>

<mosaic_0001>
module attributes {stable_mosaic.version = 11 : i64} {
  func.func @_add_kernel(%arg0: i32, %arg1: memref<1x2048xf32, #tpu.memory_space<vmem>>, %arg2: memref<1x2048xf32, #tpu.memory_space<vmem>>, %arg3: memref<1x2048xf32, #tpu.memory_space<vmem>>) attributes {dimension_semantics = [#tpu.dimension_semantics<parallel>], iteration_bounds = array<i64: 1>, scalar_prefetch = 0 : i64, scratch_operands = 0 : i64, tpu.core_type = #tpu.core_type<tc>, window_params = [{transform_indices = @transform_0, window_bounds = array<i64: 1, 2048>}, {transform_indices = @transform_1, window_bounds = array<i64: 1, 2048>}, {transform_indices = @transform_2, window_bounds = array<i64: 1, 2048>}]} {
    %c0 = arith.constant 0 : index
    %c0_0 = arith.constant 0 : index
    %0 = vector.load %arg1[%c0, %c0_0] : memref<1x2048xf32, #tpu.memory_space<vmem>>, vector<1x2048xf32>
    %c0_1 = arith.constant 0 : index
    %c0_2 = arith.constant 0 : index
    %1 = vector.load %arg2[%c0_1, %c0_2] : memref<1x2048xf32, #tpu.memory_space<vmem>>, vector<1x2048xf32>
    %2 = arith.addf %0, %1 : vector<1x2048xf32>
    %c0_3 = arith.constant 0 : index
    %c0_4 = arith.constant 0 : index
    %3 = vector.load %arg3[%c0_3, %c0_4] : memref<1x2048xf32, #tpu.memory_space<vmem>>, vector<1x2048xf32>
    tpu.vector_store %arg3[%c0_3, %c0_4], %2 {strides = array<i32>} : memref<1x2048xf32, #tpu.memory_space<vmem>>, vector<1x2048xf32>,
    return
  }
  func.func @transform_0(%arg0: i32) -> (i32, i32) {
    %c0_i32 = arith.constant 0 : i32
    %c0_i32_0 = arith.constant 0 : i32
    return %arg0, %c0_i32 : i32, i32
  }
  func.func @transform_1(%arg0: i32) -> (i32, i32) {
    %c0_i32 = arith.constant 0 : i32
    %c0_i32_0 = arith.constant 0 : i32
    return %arg0, %c0_i32 : i32, i32
  }
  func.func @transform_2(%arg0: i32) -> (i32, i32) {
    %c0_i32 = arith.constant 0 : i32
    %c0_i32_0 = arith.constant 0 : i32
    return %arg0, %c0_i32 : i32, i32
  }
}

</mosaic_0001>

<bundles_post_ra>
// kernel: tpu_custom_call.1
= control target key start
LH: loop header
LB: loop body
LE: loop exit
PB: predicated region body
PF: predicated region fallthrough
CT: control target
= control target key end

     0   :  { %7 = vsyncpa [#allocation3], 0  ;;  %s189_s0 = inlined_call_operand.hbm [shape: f32[1,2048], index: 0, kind: input, shape index: {}]   ;;  %s190_s1 = inlined_call_operand.hbm [shape: f32[1,2048], index: 1, kind: input, shape index: {}]   ;;  %s191_s2 = inlined_call_operand.hbm [shape: f32[1,2048], index: 2, kind: output, shape index: {}]  }
   0x1   :  { %8 = vsyncpa [#allocation6], 0 }
   0x2   :  { %9 = vsyncpa [#allocation4], 0  ;;  %s135_s9 = smov [#allocation2]   ;;  %s136_s11 = smov [#allocation5]  }
   0x3   :  { %s16_s10 = sshll.u32 %s135_s9, 4  ;;  %s26_s12 = sshll.u32 %s136_s11, 4  ;;  %s17_s10 = int_to_ptr.vmem [resolvable:$true] %s16_s10  ;;  %s27_s12 = int_to_ptr.vmem [resolvable:$true] %s26_s12 }
   0x4   :  { %s63_s15 = scalar_lea.hbm %s189_s0, 256 }
   0x5   :  { %p64_p0 = scmp.ne.s32.totalorder %s189_s0, %s63_s15  ;;  %p67_p1 = scmp.lt.u32.totalorder %s63_s15, %s189_s0 }
   0x7   :  { %p69_p2 = pnand %p67_p1, %p64_p0 }
   0x9   :  { %72 = shalt.err (!%p69_p2)
}
   0xa   :  { %s73_s20 = scalar_lea.vmem %s17_s10, 256  ;;  %p78_p4 = scmp.lt.s32.totalorder %s17_s10, %s17_s10 }
   0xb   :  { %p74_p3 = scmp.ne.s32.totalorder %s17_s10, %s73_s20  ;;  %p79_p5 = scmp.lt.s32.totalorder %s73_s20, %s73_s20 }
   0xd   :  { %p80_p6 = por %p79_p5, %p78_p4 }
   0xf   :  { %p81_p7 = pnand %p80_p6, %p74_p3 }
  0x11   :  { %84 = shalt.err (!%p81_p7)
}
  0x12   :  { %19 = dma.hbm_to_vmem [thread:$0]  %s189_s0, 256, %s17_s10, [#allocation3]  }
  0x13   :  { %s85_s25 = scalar_lea.hbm %s190_s1, 256 }
  0x14   :  { %p86_p8 = scmp.ne.s32.totalorder %s190_s1, %s85_s25  ;;  %p89_p9 = scmp.lt.u32.totalorder %s85_s25, %s190_s1 }
  0x16   :  { %p91_p10 = pnand %p89_p9, %p86_p8 }
  0x18   :  { %94 = shalt.err (!%p91_p10)
}
  0x19   :  { %s95_s30 = scalar_lea.vmem %s27_s12, 256  ;;  %p100_p12 = scmp.lt.s32.totalorder %s27_s12, %s27_s12 }
  0x1a   :  { %p96_p11 = scmp.ne.s32.totalorder %s27_s12, %s95_s30  ;;  %p101_p13 = scmp.lt.s32.totalorder %s95_s30, %s95_s30 }
  0x1c   :  { %p102_p0 = por %p101_p13, %p100_p12 }
  0x1e   :  { %p103_p1 = pnand %p102_p0, %p96_p11 }
  0x20   :  { %106 = shalt.err (!%p103_p1)
}
  0x21   :  { %29 = dma.hbm_to_vmem [thread:$0]  %s190_s1, 256, %s27_s12, [#allocation6]  }
  0x22   :  { %129 = dma.done.wait [#allocation3], 256  }
  0x23   :  { %130 = vsyncadd [#allocation3], 4294967040 }
  0x24   :  { %131 = dma.done.wait [#allocation6], 256  }
  0x25   :  { %132 = vsyncadd [#allocation6], 4294967040  ;;  %s137_s4 = smov [#allocation7]   ;;  %v36_v0 = vld [vmem:[#allocation2] sm:$0xff]  ;;  %v38_v1 = vld [vmem:[#allocation5] sm:$0xff] }
  0x26   :  { %s50_s5 = sshll.u32 %s137_s4, 4  ;;  %v37_v2 = vld [vmem:[#allocation2 + $0x8] sm:$0xff]  ;;  %v40_v3 = vadd.f32 %v38_v1, %v36_v0  ;;  %v39_v4 = vld [vmem:[#allocation5 + $0x8] sm:$0xff]  ;;  %s51_s5 = int_to_ptr.vmem [resolvable:$true] %s50_s5 }
  0x27   :  { %v41_v5 = vadd.f32 %v39_v4, %v37_v2  ;;  %s107_s6 = scalar_lea.vmem %s51_s5, 256  ;;  %p112_p3 = scmp.lt.s32.totalorder %s51_s5, %s51_s5 }
  0x28   :  { %42 = vst [vmem:[#allocation7] sm:$0xff] %v40_v3  ;;  %p108_p2 = scmp.ne.s32.totalorder %s51_s5, %s107_s6  ;;  %p113_p4 = scmp.lt.s32.totalorder %s107_s6, %s107_s6 }
  0x29   :  { %43 = vst [vmem:[#allocation7 + $0x8] sm:$0xff] %v41_v5 }
  0x2a   :  { %p114_p5 = por %p113_p4, %p112_p3 }
  0x2c   :  { %p115_p6 = pnand %p114_p5, %p108_p2 }
  0x2e   :  { %118 = shalt.err (!%p115_p6)
}
  0x2f   :  { %s119_s8 = scalar_lea.hbm %s191_s2, 256 }
  0x30   :  { %p120_p7 = scmp.ne.s32.totalorder %s191_s2, %s119_s8  ;;  %p123_p8 = scmp.lt.u32.totalorder %s119_s8, %s191_s2 }
  0x32   :  { %p125_p9 = pnand %p123_p8, %p120_p7 }
  0x34   :  { %128 = shalt.err (!%p125_p9)
}
  0x35   :  { %53 = dma.vmem_to_hbm [thread:$0]  %s51_s5, 256, %s191_s2, [#allocation4]  }
  0x36   :  { %133 = dma.done.wait [#allocation4], 256  }
  0x37   :  { %134 = vsyncadd [#allocation4], 4294967040 }
  0x38   :  { %57 = vsyncpa [#allocation3], 1 }
  0x39   :  { %58 = vsyncpa [#allocation6], 1 }
  0x3a   :  { %59 = vsyncpa [#allocation4], 1 }

</bundles_post_ra>
